<compile_context>
chip_gen: v7x
topology: tpu7x:2x2x1
jax: 0.10.0
libtpu: 0.0.40
codegen_flags: <defaults>
</compile_context>

<pallas_src>
import functools
import math

import jax
import jax.numpy as jnp
from jax.experimental import pallas as pl
from jax.experimental.pallas import tpu as pltpu


def _build_pe(max_len: int, d_model: int) -> jnp.ndarray:
    """Sinusoidal positional-encoding buffer, identical to the torch __init__."""
    position = jnp.arange(0, max_len, dtype=jnp.float32)[:, None]           # [L, 1]
    div_term = jnp.exp(
        jnp.arange(0, d_model, 2, dtype=jnp.float32)
        * (-math.log(10000.0) / d_model)
    )                                                                        # [D/2]
    pe = jnp.zeros((max_len, d_model), dtype=jnp.float32)
    pe = pe.at[:, 0::2].set(jnp.sin(position * div_term))
    pe = pe.at[:, 1::2].set(jnp.cos(position * div_term))
    # unsqueeze(0).transpose(0, 1)  ->  [max_len, 1, d_model]  (torch buffer shape)
    return pe[:, None, :]


def _pe_dropout_kernel(x_ref, pe_ref, *rest, p, training, batch):
    """x_ref: [bs, B*D]; pe_ref: [bs, D]; optional rand_ref: [bs, B*D]; o_ref."""
    use_dropout = training and p > 0.0
    if use_dropout:
        rand_ref, o_ref = rest
    else:
        (o_ref,) = rest

    # Broadcast pe over batch along the lane axis: [bs, D] -> [bs, B*D].
    pe_lanes = jnp.tile(pe_ref[...], (1, batch))
    y = x_ref[...] + pe_lanes

    if use_dropout:
        if p >= 1.0:
            # nn.Dropout(p=1) zeros everything.
            y = jnp.zeros_like(y)
        else:
            scale = 1.0 / (1.0 - p)
            keep = rand_ref[...] >= jnp.float32(p)       # P(keep) = 1 - p
            # single select + single mul (inverted dropout)
            y = y * jnp.where(keep, jnp.float32(scale), jnp.float32(0.0))

    o_ref[...] = y.astype(o_ref.dtype)


def positional_encoding_forward(x, pe, key=None, *, p=0.1, training=False):
    """x: [S, B, D]; pe: [max_len, 1, D] (or [max_len, D]); key: PRNGKey for dropout."""
    S, B, D = x.shape
    pe2d = pe.reshape(pe.shape[0], pe.shape[-1])     # squeeze -> [max_len, D] (free)
    x2d = x.reshape(S, B * D)                        # lane-dense slab (free reshape)

    # ~2 MiB x-tiles, rows a multiple of 8 (sublane), covering S with >=1 step.
    row_bytes = B * D * x.dtype.itemsize
    rows = max(8, ((2 << 20) // max(row_bytes, 1)) // 8 * 8)
    block_s = S if S <= rows else rows
    if block_s % 8 != 0 and block_s != pe2d.shape[0]:
        # Tiny ragged S: give pe a matching leading dim so its BlockSpec is legal.
        pe2d = jax.lax.dynamic_slice_in_dim(pe2d, 0, S, axis=0)

    grid = (pl.cdiv(S, block_s),)
    use_dropout = training and p > 0.0

    in_specs = [
        pl.BlockSpec((block_s, B * D), lambda i: (i, 0)),   # x slab tile
        pl.BlockSpec((block_s, D), lambda i: (i, 0)),       # pe rows (first S only)
    ]
    args = [x2d, pe2d]
    if use_dropout:
        assert key is not None, "dropout in training mode needs a PRNG key"
        rand = jax.random.uniform(key, (S, B * D), dtype=jnp.float32)
        in_specs.append(pl.BlockSpec((block_s, B * D), lambda i: (i, 0)))
        args.append(rand)

    kernel = functools.partial(
        _pe_dropout_kernel, p=float(p), training=training, batch=B
    )
    out2d = pl.pallas_call(
        kernel,
        out_shape=jax.ShapeDtypeStruct((S, B * D), x.dtype),
        grid=grid,
        in_specs=in_specs,
        out_specs=pl.BlockSpec((block_s, B * D), lambda i: (i, 0)),
        compiler_params=pltpu.CompilerParams(
            dimension_semantics=("parallel",)    # independent tiles -> v7x 2-TC
        ),
    )(*args)
    return out2d.reshape(S, B, D)


if __name__ == "__main__":
    d_model = 32
    max_len = 64          # small synthetic max_len (module default is 5000)
    seq_len = 8
    batch = 2
    p = 0.1

    key = jax.random.PRNGKey(0)
    x = jax.random.normal(key, (seq_len, batch, d_model), dtype=jnp.float32)
    pe = _build_pe(max_len, d_model)

    # --- eval mode (dropout = identity): exact check against pure-JAX ref ---
    out_eval = positional_encoding_forward(x, pe, p=p, training=False)
    out_eval = jax.block_until_ready(out_eval)
    ref = x + pe[:seq_len]
    assert jnp.allclose(out_eval, ref, atol=1e-6), "eval-mode mismatch"

    # --- training mode: deterministic check (same key -> same mask) ---
    key_drop = jax.random.PRNGKey(42)
    out_train = positional_encoding_forward(x, pe, key=key_drop, p=p, training=True)
    out_train = jax.block_until_ready(out_train)
    rand = jax.random.uniform(key_drop, (seq_len, batch * d_model), dtype=jnp.float32)
    keep = (rand >= p).reshape(seq_len, batch, d_model)
    ref_train = jnp.where(keep, ref / (1.0 - p), 0.0)
    assert jnp.allclose(out_train, ref_train, atol=1e-5), "train-mode mismatch"

    print("KERNEL_OK")
</pallas_src>

<mosaic_0001>
module attributes {stable_mosaic.version = 11 : i64} {
  func.func @_pe_dropout_kernel(%arg0: i32, %arg1: memref<8x64xf32, #tpu.memory_space<vmem>>, %arg2: memref<8x32xf32, #tpu.memory_space<vmem>>, %arg3: memref<8x64xf32, #tpu.memory_space<vmem>>) attributes {dimension_semantics = [#tpu.dimension_semantics<parallel>], iteration_bounds = array<i64: 1>, scalar_prefetch = 0 : i64, scratch_operands = 0 : i64, tpu.core_type = #tpu.core_type<tc>, window_params = [{transform_indices = @transform_0, window_bounds = array<i64: 8, 64>}, {transform_indices = @transform_1, window_bounds = array<i64: 8, 32>}, {transform_indices = @transform_2, window_bounds = array<i64: 8, 64>}]} {
    %c0 = arith.constant 0 : index
    %c0_0 = arith.constant 0 : index
    %0 = vector.load %arg2[%c0, %c0_0] : memref<8x32xf32, #tpu.memory_space<vmem>>, vector<8x32xf32>
    %1 = tpu.concatenate %0, %0 in 1 : vector<8x32xf32>, vector<8x32xf32> -> vector<8x64xf32>
    %c0_1 = arith.constant 0 : index
    %c0_2 = arith.constant 0 : index
    %2 = vector.load %arg1[%c0_1, %c0_2] : memref<8x64xf32, #tpu.memory_space<vmem>>, vector<8x64xf32>
    %3 = arith.addf %2, %1 : vector<8x64xf32>
    %c0_3 = arith.constant 0 : index
    %c0_4 = arith.constant 0 : index
    %4 = vector.load %arg3[%c0_3, %c0_4] : memref<8x64xf32, #tpu.memory_space<vmem>>, vector<8x64xf32>
    tpu.vector_store %arg3[%c0_3, %c0_4], %3 {strides = array<i32>} : memref<8x64xf32, #tpu.memory_space<vmem>>, vector<8x64xf32>,
    return
  }
  func.func @transform_0(%arg0: i32) -> (i32, i32) {
    %c0_i32 = arith.constant 0 : i32
    %c0_i32_0 = arith.constant 0 : i32
    return %arg0, %c0_i32 : i32, i32
  }
  func.func @transform_1(%arg0: i32) -> (i32, i32) {
    %c0_i32 = arith.constant 0 : i32
    %c0_i32_0 = arith.constant 0 : i32
    return %arg0, %c0_i32 : i32, i32
  }
  func.func @transform_2(%arg0: i32) -> (i32, i32) {
    %c0_i32 = arith.constant 0 : i32
    %c0_i32_0 = arith.constant 0 : i32
    return %arg0, %c0_i32 : i32, i32
  }
}

</mosaic_0001>

<bundles_post_ra>
// kernel: tpu_custom_call.1
= control target key start
LH: loop header
LB: loop body
LE: loop exit
PB: predicated region body
PF: predicated region fallthrough
CT: control target
= control target key end

     0   :  { %s98_s0 = inlined_call_operand.vmem [shape: f32[8,64], index: 0, kind: input, shape index: {}]   ;;  %s99_s1 = inlined_call_operand.vmem [shape: f32[64,32], index: 1, kind: input, shape index: {}]   ;;  %s100_s2 = inlined_call_operand.hbm [shape: f32[8,64], index: 2, kind: output, shape index: {}]  }
   0x1   :  { %v12_v0 = vld [vmem:[%s99_s1] sm:$0xff] }
   0x2   :  { %7 = vsyncpa [#allocation3], 0  ;;  %s63_s11 = smov 32   ;;  %vm17_vm0 = vcmask 261120   ;;  %v19_v1 = vld [vmem:[%s98_s0] sm:$0xff]  ;;  %s64_s14 = smov [#allocation2]  }
   0x3   :  { %14 = vrot.lane.b32.xlu0 %v12_v0, %s63_s11  ;;  %s29_s15 = sshll.u32 %s64_s14, 4  ;;  %vm21_vm1 = vcmask 523264   ;;  %s30_s15 = int_to_ptr.vmem [resolvable:$true] %s29_s15 }
   0x4   :  { %s39_s16 = scalar_lea.vmem %s30_s15, 128  ;;  %p44_p1 = scmp.lt.s32.totalorder %s30_s15, %s30_s15 }
   0x5   :  { %p40_p0 = scmp.ne.s32.totalorder %s30_s15, %s39_s16  ;;  %p45_p2 = scmp.lt.s32.totalorder %s39_s16, %s39_s16 }
   0x7   :  { %p46_p3 = por %p45_p2, %p44_p1 }
   0x9   :  { %p47_p4 = pnand %p46_p3, %p40_p0 }
  0x75   :  { %v15_v2 = vpop.permute.xlu0 %14 }
  0x76   :  { %v18_v3 = vsel %vm17_vm0, %v12_v0, %v15_v2 }
  0x77   :  { %v20_v4 = vadd.f32 %v19_v1, %v18_v3 }
  0x79   :  { %22 = vst.msk [vmem:[#allocation2] sm:$0xff] %vm21_vm1, %v20_v4 }
  0x7a   :  { %50 = shalt.err (!%p47_p4)
}
  0x7b   :  { %s51_s18 = scalar_lea.hbm %s100_s2, 128 }
  0x7c   :  { %p52_p5 = scmp.ne.s32.totalorder %s100_s2, %s51_s18  ;;  %p55_p6 = scmp.lt.u32.totalorder %s51_s18, %s100_s2 }
  0x7e   :  { %p57_p7 = pnand %p55_p6, %p52_p5 }
  0x80   :  { %60 = shalt.err (!%p57_p7)
}
  0x81   :  { %32 = dma.vmem_to_hbm [thread:$0]  %s30_s15, 128, %s100_s2, [#allocation3]  }
  0x82   :  { %61 = dma.done.wait [#allocation3], 128  }
  0x83   :  { %62 = vsyncadd [#allocation3], 4294967168 }
  0x84   :  { %36 = vsyncpa [#allocation3], 1 }

</bundles_post_ra>
